<compile_context>
chip_gen: v5e
topology: v5e:2x2
jax: 0.10.0
libtpu: 0.0.40
codegen_flags: <defaults>
</compile_context>

<pallas_src>
import math

import jax
import jax.numpy as jnp
from jax.experimental import pallas as pl
from jax.experimental.pallas import tpu as pltpu

# ---- model hyper-parameters (small, consistent with the module) ----
B = 2              # batch
T = 8              # num_tokens (= context_length here)
D_IN = 32          # d_in
D_OUT = 32         # d_out
NUM_HEADS = 4
HEAD_DIM = D_OUT // NUM_HEADS
BH = B * NUM_HEADS # combined (batch, head) leading batch dim used inside the kernel
DROPOUT = 0.0      # eval-mode dropout
QKV_BIAS = False

NEG_INF = -1e30    # finite "-inf": exp() underflows to 0, never produces NaN


def mha_kernel(xz_ref, wqkv_ref, wo_ref, bo_ref, mask_ref, o_ref):
    """Single-invocation MHA forward.

    xz_ref   : (B*H, T, D_IN)      activations replicated per head (z = b*H + h)
    wqkv_ref : (B*H, D_IN, 3*Hd)   per-head [Wq | Wk | Wv] columns
    wo_ref   : (B*H, Hd, D_OUT)    per-head row-blocks of the output projection
    bo_ref   : (1, D_OUT)          output-projection bias
    mask_ref : (T, T)              additive causal mask (0 / -1e30)
    o_ref    : (B, T, D_OUT)
    """
    scale = 1.0 / math.sqrt(HEAD_DIM)

    # Fused QKV projection: one batched dot_general for all of Q, K, V and all heads.
    qkv = jnp.einsum("ztd,zdk->ztk", xz_ref[...], wqkv_ref[...],
                     preferred_element_type=jnp.float32)          # (B*H, T, 3*Hd)
    q = qkv[:, :, 0:HEAD_DIM] * scale                             # (B*H, T, Hd)
    k = qkv[:, :, HEAD_DIM:2 * HEAD_DIM]
    v = qkv[:, :, 2 * HEAD_DIM:3 * HEAD_DIM]

    # Scores (all heads at once) + additive causal mask.
    s = jnp.einsum("zqd,zkd->zqk", q, k,
                   preferred_element_type=jnp.float32)            # (B*H, T, T)
    s = s + mask_ref[...][None, :, :]

    # Numerically stable softmax over the key axis.
    m = jnp.max(s, axis=-1, keepdims=True)
    e = jnp.exp(s - m)
    w = e / jnp.sum(e, axis=-1, keepdims=True)
    # TODO(synk): attention-weight dropout omitted (eval/inference semantics).

    ctx = jnp.einsum("zqk,zkd->zqd", w, v,
                     preferred_element_type=jnp.float32)          # (B*H, T, Hd)

    # Per-head output projection; summing the head contributions replaces the
    # reference's transpose(1,2)+reshape+concat with a few VPU vreg adds.
    out_z = jnp.einsum("ztd,zdo->zto", ctx, wo_ref[...],
                       preferred_element_type=jnp.float32)        # (B*H, T, D_OUT)

    bo = bo_ref[...]                                              # (1, D_OUT)
    for b in range(B):                                            # B=2: static unroll
        acc = out_z[b * NUM_HEADS]
        for h in range(1, NUM_HEADS):
            acc = acc + out_z[b * NUM_HEADS + h]
        o_ref[b] = (acc + bo).astype(o_ref.dtype)


@jax.jit
def mha_forward(x, wq, wk, wv, wo, bo):
    """x: (B, T, D_IN). wq/wk/wv/wo are (in, out) (= torch W.T); bo is (1, D_OUT)."""
    # --- layout packing (plain XLA, outside the kernel) -----------------------
    def per_head(wt):                      # (D_IN, D_OUT) -> (H, D_IN, Hd)
        return wt.reshape(D_IN, NUM_HEADS, HEAD_DIM).transpose(1, 0, 2)

    wqkv_h = jnp.concatenate([per_head(wq), per_head(wk), per_head(wv)],
                             axis=-1)                                        # (H, D_IN, 3*Hd)
    wqkv_z = jnp.broadcast_to(wqkv_h[None],
                              (B, NUM_HEADS, D_IN, 3 * HEAD_DIM)
                              ).reshape(BH, D_IN, 3 * HEAD_DIM)              # (B*H, D_IN, 3*Hd)
    wo_z = jnp.broadcast_to(wo.reshape(NUM_HEADS, HEAD_DIM, D_OUT)[None],
                            (B, NUM_HEADS, HEAD_DIM, D_OUT)
                            ).reshape(BH, HEAD_DIM, D_OUT)                   # (B*H, Hd, D_OUT)

    # Replicate activations per head so heads form a leading batch dim (z = b*H + h).
    # Pure layout plumbing; ~8 KiB total so the extra HBM traffic is negligible.
    x_z = jnp.broadcast_to(x[:, None], (B, NUM_HEADS, T, D_IN)
                           ).reshape(BH, T, D_IN)                            # (B*H, T, D_IN)

    # Additive causal mask precomputed once (finite -1e30 instead of -inf).
    causal = jnp.triu(jnp.ones((T, T), dtype=bool), k=1)
    mask_add = jnp.where(causal, jnp.float32(NEG_INF), jnp.float32(0.0))

    vmem = pl.BlockSpec(memory_space=pltpu.MemorySpace.VMEM)
    return pl.pallas_call(
        mha_kernel,
        out_shape=jax.ShapeDtypeStruct((B, T, D_OUT), x.dtype),
        in_specs=[vmem, vmem, vmem, vmem, vmem],
        out_specs=vmem,
    )(x_z, wqkv_z, wo_z, bo, mask_add)


def reference_forward(x, wq, wk, wv, wo, bo):
    """Pure-JAX reference mirroring the PyTorch forward."""
    b, t, _ = x.shape
    q = x @ wq
    k = x @ wk
    v = x @ wv
    q = q.reshape(b, t, NUM_HEADS, HEAD_DIM).transpose(0, 2, 1, 3)
    k = k.reshape(b, t, NUM_HEADS, HEAD_DIM).transpose(0, 2, 1, 3)
    v = v.reshape(b, t, NUM_HEADS, HEAD_DIM).transpose(0, 2, 1, 3)
    scores = jnp.einsum("bhqd,bhkd->bhqk", q, k)
    mask = jnp.triu(jnp.ones((t, t), dtype=bool), k=1)
    scores = jnp.where(mask[None, None], -jnp.inf, scores)
    weights = jax.nn.softmax(scores / math.sqrt(HEAD_DIM), axis=-1)
    ctx = jnp.einsum("bhqk,bhkd->bhqd", weights, v)
    ctx = ctx.transpose(0, 2, 1, 3).reshape(b, t, D_OUT)
    return ctx @ wo + bo


if __name__ == "__main__":
    key = jax.random.PRNGKey(0)
    kx, kq, kk, kv, ko, kb = jax.random.split(key, 6)

    # deterministic parameter init (torch Linear stores W as (out, in); we keep (in, out))
    x = jax.random.normal(kx, (B, T, D_IN), dtype=jnp.float32)
    lim_in = 1.0 / math.sqrt(D_IN)
    lim_out = 1.0 / math.sqrt(D_OUT)
    wq = jax.random.uniform(kq, (D_IN, D_OUT), jnp.float32, -lim_in, lim_in)
    wk = jax.random.uniform(kk, (D_IN, D_OUT), jnp.float32, -lim_in, lim_in)
    wv = jax.random.uniform(kv, (D_IN, D_OUT), jnp.float32, -lim_in, lim_in)
    wo = jax.random.uniform(ko, (D_OUT, D_OUT), jnp.float32, -lim_out, lim_out)
    bo = jax.random.uniform(kb, (1, D_OUT), jnp.float32, -lim_out, lim_out)

    out = mha_forward(x, wq, wk, wv, wo, bo)
    out = jax.block_until_ready(out)

    ref = reference_forward(x, wq, wk, wv, wo, bo)
    assert out.shape == (B, T, D_OUT)
    assert jnp.allclose(out, ref, atol=2e-5, rtol=2e-5), "mismatch vs reference"

    print("KERNEL_OK")
</pallas_src>

<mosaic_0001>
module attributes {stable_mosaic.version = 11 : i64} {
  func.func @mha_kernel(%arg0: memref<8x8x32xf32, #tpu.memory_space<vmem>>, %arg1: memref<8x32x24xf32, #tpu.memory_space<vmem>>, %arg2: memref<8x8x32xf32, #tpu.memory_space<vmem>>, %arg3: memref<1x32xf32, #tpu.memory_space<vmem>>, %arg4: memref<8x8xf32, #tpu.memory_space<vmem>>, %arg5: memref<2x8x32xf32, #tpu.memory_space<vmem>>) attributes {dimension_semantics = [], scalar_prefetch = 0 : i64, scratch_operands = 0 : i64, tpu.core_type = #tpu.core_type<tc>} {
    %c0 = arith.constant 0 : index
    %c0_0 = arith.constant 0 : index
    %c0_1 = arith.constant 0 : index
    %0 = vector.load %arg0[%c0, %c0_0, %c0_1] : memref<8x8x32xf32, #tpu.memory_space<vmem>>, vector<8x8x32xf32>
    %c0_2 = arith.constant 0 : index
    %c0_3 = arith.constant 0 : index
    %c0_4 = arith.constant 0 : index
    %1 = vector.load %arg1[%c0_2, %c0_3, %c0_4] : memref<8x32x24xf32, #tpu.memory_space<vmem>>, vector<8x32x24xf32>
    "tpu.trace_start"() <{level = 10 : i32, message = "ztd,zdk->ztk"}> : () -> ()
    %cst = arith.constant dense<0.000000e+00> : vector<8x8x24xf32>
    %2 = tpu.matmul %0, %1, %cst {dimension_numbers = #tpu.dot_dimension_numbers<[2], [1], [1], [2], [0, 0, 0, 1, 1, 2], [0], [0]>} : vector<8x8x32xf32>, vector<8x32x24xf32>, vector<8x8x24xf32> -> vector<8x8x24xf32>
    "tpu.trace_stop"() : () -> ()
    %3 = vector.extract_strided_slice %2 {offsets = [0, 0, 0], sizes = [8, 8, 8], strides = [1, 1, 1]} : vector<8x8x24xf32> to vector<8x8x8xf32>
    %cst_5 = arith.constant 0.353553385 : f32
    %4 = vector.broadcast %cst_5 : f32 to vector<8x8x8xf32>
    %5 = arith.mulf %3, %4 : vector<8x8x8xf32>
    %6 = vector.extract_strided_slice %2 {offsets = [0, 0, 8], sizes = [8, 8, 8], strides = [1, 1, 1]} : vector<8x8x24xf32> to vector<8x8x8xf32>
    %7 = vector.extract_strided_slice %2 {offsets = [0, 0, 16], sizes = [8, 8, 8], strides = [1, 1, 1]} : vector<8x8x24xf32> to vector<8x8x8xf32>
    "tpu.trace_start"() <{level = 10 : i32, message = "zqd,zkd->zqk"}> : () -> ()
    %cst_6 = arith.constant dense<0.000000e+00> : vector<8x8x8xf32>
    %8 = tpu.matmul %5, %6, %cst_6 {dimension_numbers = #tpu.dot_dimension_numbers<[2], [2], [1], [1], [0, 0, 0, 1, 1, 1], [0], [0]>} : vector<8x8x8xf32>, vector<8x8x8xf32>, vector<8x8x8xf32> -> vector<8x8x8xf32>
    "tpu.trace_stop"() : () -> ()
    %c0_7 = arith.constant 0 : index
    %c0_8 = arith.constant 0 : index
    %9 = vector.load %arg4[%c0_7, %c0_8] : memref<8x8xf32, #tpu.memory_space<vmem>>, vector<8x8xf32>
    %10 = vector.shape_cast %9 : vector<8x8xf32> to vector<1x8x8xf32>
    %11 = vector.broadcast %10 : vector<1x8x8xf32> to vector<8x8x8xf32>
    %12 = arith.addf %8, %11 : vector<8x8x8xf32>
    %cst_9 = arith.constant dense<0xFF800000> : vector<8x8xf32>
    %13 = vector.multi_reduction <maximumf>, %12, %cst_9 [2] : vector<8x8x8xf32> to vector<8x8xf32>
    %14 = vector.shape_cast %13 : vector<8x8xf32> to vector<8x8x1xf32>
    %15 = vector.broadcast %14 : vector<8x8x1xf32> to vector<8x8x8xf32>
    %16 = arith.subf %12, %15 : vector<8x8x8xf32>
    %17 = math.exp %16 : vector<8x8x8xf32>
    %cst_10 = arith.constant dense<0.000000e+00> : vector<8x8xf32>
    %18 = vector.multi_reduction <add>, %17, %cst_10 [2] : vector<8x8x8xf32> to vector<8x8xf32>
    %19 = vector.shape_cast %18 : vector<8x8xf32> to vector<8x8x1xf32>
    %20 = vector.broadcast %19 : vector<8x8x1xf32> to vector<8x8x8xf32>
    %21 = arith.divf %17, %20 : vector<8x8x8xf32>
    "tpu.trace_start"() <{level = 10 : i32, message = "zqk,zkd->zqd"}> : () -> ()
    %cst_11 = arith.constant dense<0.000000e+00> : vector<8x8x8xf32>
    %22 = tpu.matmul %21, %7, %cst_11 {dimension_numbers = #tpu.dot_dimension_numbers<[2], [1], [1], [2], [0, 0, 0, 1, 1, 2], [0], [0]>} : vector<8x8x8xf32>, vector<8x8x8xf32>, vector<8x8x8xf32> -> vector<8x8x8xf32>
    "tpu.trace_stop"() : () -> ()
    %c0_12 = arith.constant 0 : index
    %c0_13 = arith.constant 0 : index
    %c0_14 = arith.constant 0 : index
    %23 = vector.load %arg2[%c0_12, %c0_13, %c0_14] : memref<8x8x32xf32, #tpu.memory_space<vmem>>, vector<8x8x32xf32>
    "tpu.trace_start"() <{level = 10 : i32, message = "ztd,zdo->zto"}> : () -> ()
    %cst_15 = arith.constant dense<0.000000e+00> : vector<8x8x32xf32>
    %24 = tpu.matmul %22, %23, %cst_15 {dimension_numbers = #tpu.dot_dimension_numbers<[2], [1], [1], [2], [0, 0, 0, 1, 1, 2], [0], [0]>} : vector<8x8x8xf32>, vector<8x8x32xf32>, vector<8x8x32xf32> -> vector<8x8x32xf32>
    "tpu.trace_stop"() : () -> ()
    %c0_16 = arith.constant 0 : index
    %c0_17 = arith.constant 0 : index
    %25 = vector.load %arg3[%c0_16, %c0_17] : memref<1x32xf32, #tpu.memory_space<vmem>>, vector<1x32xf32>
    %26 = vector.extract_strided_slice %24 {offsets = [0, 0, 0], sizes = [1, 8, 32], strides = [1, 1, 1]} : vector<8x8x32xf32> to vector<1x8x32xf32>
    %27 = vector.shape_cast %26 : vector<1x8x32xf32> to vector<8x32xf32>
    %28 = vector.extract_strided_slice %24 {offsets = [1, 0, 0], sizes = [1, 8, 32], strides = [1, 1, 1]} : vector<8x8x32xf32> to vector<1x8x32xf32>
    %29 = vector.shape_cast %28 : vector<1x8x32xf32> to vector<8x32xf32>
    %30 = arith.addf %27, %29 : vector<8x32xf32>
    %31 = vector.extract_strided_slice %24 {offsets = [2, 0, 0], sizes = [1, 8, 32], strides = [1, 1, 1]} : vector<8x8x32xf32> to vector<1x8x32xf32>
    %32 = vector.shape_cast %31 : vector<1x8x32xf32> to vector<8x32xf32>
    %33 = arith.addf %30, %32 : vector<8x32xf32>
    %34 = vector.extract_strided_slice %24 {offsets = [3, 0, 0], sizes = [1, 8, 32], strides = [1, 1, 1]} : vector<8x8x32xf32> to vector<1x8x32xf32>
    %35 = vector.shape_cast %34 : vector<1x8x32xf32> to vector<8x32xf32>
    %36 = arith.addf %33, %35 : vector<8x32xf32>
    %37 = vector.broadcast %25 : vector<1x32xf32> to vector<8x32xf32>
    %38 = arith.addf %36, %37 : vector<8x32xf32>
    %c0_18 = arith.constant 0 : index
    %c0_19 = arith.constant 0 : index
    %c0_20 = arith.constant 0 : index
    %39 = vector.load %arg5[%c0_18, %c0_19, %c0_20] : memref<2x8x32xf32, #tpu.memory_space<vmem>>, vector<1x8x32xf32>
    %40 = vector.shape_cast %39 : vector<1x8x32xf32> to vector<8x32xf32>
    %41 = vector.shape_cast %38 : vector<8x32xf32> to vector<1x8x32xf32>
    tpu.vector_store %arg5[%c0_18, %c0_19, %c0_20], %41 {strides = array<i32>} : memref<2x8x32xf32, #tpu.memory_space<vmem>>, vector<1x8x32xf32>,
    %42 = vector.extract_strided_slice %24 {offsets = [4, 0, 0], sizes = [1, 8, 32], strides = [1, 1, 1]} : vector<8x8x32xf32> to vector<1x8x32xf32>
    %43 = vector.shape_cast %42 : vector<1x8x32xf32> to vector<8x32xf32>
    %44 = vector.extract_strided_slice %24 {offsets = [5, 0, 0], sizes = [1, 8, 32], strides = [1, 1, 1]} : vector<8x8x32xf32> to vector<1x8x32xf32>
    %45 = vector.shape_cast %44 : vector<1x8x32xf32> to vector<8x32xf32>
    %46 = arith.addf %43, %45 : vector<8x32xf32>
    %47 = vector.extract_strided_slice %24 {offsets = [6, 0, 0], sizes = [1, 8, 32], strides = [1, 1, 1]} : vector<8x8x32xf32> to vector<1x8x32xf32>
    %48 = vector.shape_cast %47 : vector<1x8x32xf32> to vector<8x32xf32>
    %49 = arith.addf %46, %48 : vector<8x32xf32>
    %50 = vector.extract_strided_slice %24 {offsets = [7, 0, 0], sizes = [1, 8, 32], strides = [1, 1, 1]} : vector<8x8x32xf32> to vector<1x8x32xf32>
    %51 = vector.shape_cast %50 : vector<1x8x32xf32> to vector<8x32xf32>
    %52 = arith.addf %49, %51 : vector<8x32xf32>
    %53 = vector.broadcast %25 : vector<1x32xf32> to vector<8x32xf32>
    %54 = arith.addf %52, %53 : vector<8x32xf32>
    %c1 = arith.constant 1 : index
    %c0_21 = arith.constant 0 : index
    %c0_22 = arith.constant 0 : index
    %55 = vector.load %arg5[%c1, %c0_21, %c0_22] : memref<2x8x32xf32, #tpu.memory_space<vmem>>, vector<1x8x32xf32>
    %56 = vector.shape_cast %55 : vector<1x8x32xf32> to vector<8x32xf32>
    %57 = vector.shape_cast %54 : vector<8x32xf32> to vector<1x8x32xf32>
    tpu.vector_store %arg5[%c1, %c0_21, %c0_22], %57 {strides = array<i32>} : memref<2x8x32xf32, #tpu.memory_space<vmem>>, vector<1x8x32xf32>,
    return
  }
}

</mosaic_0001>

<bundles_post_ra>
// kernel: mha_forward.1
= control target key start
LH: loop header
LB: loop body
LE: loop exit
PB: predicated region body
PF: predicated region fallthrough
CT: control target
= control target key end

     0   :  { %vm61_vm0 = vcmask 261120   ;;  %s1708_s0 = inlined_call_operand.vmem [shape: f32[8,8,32], index: 0, kind: input, shape index: {}]   ;;  %s1709_s1 = inlined_call_operand.vmem [shape: f32[8,32,24], index: 1, kind: input, shape index: {}]   ;;  %s1710_s2 = inlined_call_operand.vmem [shape: f32[8,8,32], index: 2, kind: input, shape index: {}]   ;;  %s1711_s3 = inlined_call_operand.vmem [shape: f32[1,32], index: 3, kind: input, shape index: {}]   ;;  %s1712_s4 = inlined_call_operand.vmem [shape: f32[8,8], index: 4, kind: input, shape index: {}]   ;;  %s1713_s5 = inlined_call_operand.hbm [shape: f32[2,8,32], index: 5, kind: output, shape index: {}]  }
   0x1   :  { %v32_v0 = vld [vmem:[%s1709_s1 + $0x18] sm:$0xff]  ;;  %v31_v3 = vld [vmem:[%s1709_s1 + $0x10] sm:$0xff]  ;;  %v30_v6 = vld [vmem:[%s1709_s1 + $0x8] sm:$0xff] }
   0x2   :  { %v40_v1 = vld [vmem:[%s1709_s1 + $0x58] sm:$0xff]  ;;  %77 = vmatpush.msra.mxu0 %v32_v0  ;;  %v39_v4 = vld [vmem:[%s1709_s1 + $0x50] sm:$0xff]  ;;  %v38_v7 = vld [vmem:[%s1709_s1 + $0x48] sm:$0xff] }
   0x3   :  { %v44_v2 = vld [vmem:[%s1709_s1 + $0x78] sm:$0xff]  ;;  %123 = vmatpush.msra.mxu2 %v40_v1  ;;  %v43_v5 = vld [vmem:[%s1709_s1 + $0x70] sm:$0xff]  ;;  %v42_v8 = vld [vmem:[%s1709_s1 + $0x68] sm:$0xff] }
   0x4   :  { %146 = vmatpush.msra.mxu3 %v44_v2  ;;  %78 = vmatpush.msra.mxu0 %v31_v3  ;;  %v29_v9 = vld [vmem:[%s1709_s1] sm:$0xff]  ;;  %v36_v13 = vld [vmem:[%s1709_s1 + $0x38] sm:$0xff]  ;;  %v23_v14 = vld [vmem:[%s1708_s0 + $0x10] sm:$0xff] }
   0x5   :  { %124 = vmatpush.msra.mxu2 %v39_v4  ;;  %v37_v10 = vld [vmem:[%s1709_s1 + $0x40] sm:$0xff]  ;;  %v24_v15 = vld [vmem:[%s1708_s0 + $0x18] sm:$0xff]  ;;  %100 = vmatpush.msra.mxu1 %v36_v13  ;;  %v35_v17 = vld [vmem:[%s1709_s1 + $0x30] sm:$0xff] }
   0x6   :  { %147 = vmatpush.msra.mxu3 %v43_v5  ;;  %79 = vmatpush.msra.mxu0 %v30_v6  ;;  %v41_v11 = vld [vmem:[%s1709_s1 + $0x60] sm:$0xff]  ;;  %v56_v16 = vld [vmem:[%s1709_s1 + $0xd8] sm:$0xff]  ;;  %v55_v19 = vld [vmem:[%s1709_s1 + $0xd0] sm:$0xff] }
   0x7   :  { %125 = vmatpush.msra.mxu2 %v38_v7  ;;  %v21_v12 = vld [vmem:[%s1708_s0] sm:$0xff]  ;;  %v60_v18 = vld [vmem:[%s1709_s1 + $0xf8] sm:$0xff]  ;;  %v34_v20 = vld [vmem:[%s1709_s1 + $0x28] sm:$0xff]  ;;  %101 = vmatpush.msra.mxu1 %v35_v17 }
   0x8   :  { %148 = vmatpush.msra.mxu3 %v42_v8  ;;  %80 = vmatpush.msra.mxu0 %v29_v9  ;;  %v48_v21 = vld [vmem:[%s1709_s1 + $0x98] sm:$0xff]  ;;  %v59_v22 = vld [vmem:[%s1709_s1 + $0xf0] sm:$0xff]  ;;  %v54_v24 = vld [vmem:[%s1709_s1 + $0xc8] sm:$0xff] }
   0x9   :  { %126 = vmatpush.msra.mxu2 %v37_v10  ;;  %1105 = vmatmul.msk.f32.vlgmr.msra.gmra.mxu0 %vm61_vm0, %v21_v12  ;;  %v47_v23 = vld [vmem:[%s1709_s1 + $0x90] sm:$0xff]  ;;  %v33_v25 = vld [vmem:[%s1709_s1 + $0x20] sm:$0xff]  ;;  %v22_v27 = vld [vmem:[%s1708_s0 + $0x8] sm:$0xff] }
   0xa   :  { %149 = vmatpush.msra.mxu3 %v41_v11  ;;  %1107 = vmatmul.msk.f32.vlgmr.msra.gmra.mxu2 %vm61_vm0, %v23_v14  ;;  %v53_v26 = vld [vmem:[%s1709_s1 + $0xc0] sm:$0xff]  ;;  %v58_v28 = vld [vmem:[%s1709_s1 + $0xe8] sm:$0xff] }
   0xb   :  { %1108 = vmatmul.msk.f32.vlgmr.msra.gmra.mxu3 %vm61_vm0, %v24_v15  ;;  %215 = vmatpush.msrb.mxu2 %v56_v16  ;;  %v46_v29 = vld [vmem:[%s1709_s1 + $0x88] sm:$0xff] }
   0xc   :  { %238 = vmatpush.msrb.mxu3 %v60_v18  ;;  %169 = vmatpush.msrb.mxu0 %v48_v21 }
   0xd   :  { %216 = vmatpush.msrb.mxu2 %v55_v19  ;;  %102 = vmatpush.msra.mxu1 %v34_v20 }
   0xe   :  { %239 = vmatpush.msrb.mxu3 %v59_v22  ;;  %170 = vmatpush.msrb.mxu0 %v47_v23 }
   0xf   :  { %10 = vsyncpa [#allocation3], 0  ;;  %217 = vmatpush.msrb.mxu2 %v54_v24  ;;  %103 = vmatpush.msra.mxu1 %v33_v25  ;;  %v27_v30 = vld [vmem:[%s1708_s0 + $0x30] sm:$0xff]  ;;  %v57_v31 = vld [vmem:[%s1709_s1 + $0xe0] sm:$0xff]  ;;  %s1229_s23 = smov 120   ;;  %vm258_vm1 = vcmask 64512  }
  0x10   :  { %1106 = vmatmul.msk.f32.vlgmr.msra.gmra.mxu1 %vm61_vm0, %v22_v27  ;;  %240 = vmatpush.msrb.mxu3 %v58_v28  ;;  %v28_v32 = vld [vmem:[%s1708_s0 + $0x38] sm:$0xff]  ;;  %v45_v33 = vld [vmem:[%s1709_s1 + $0x80] sm:$0xff]  ;;  %v51_v36 = vld [vmem:[%s1709_s1 + $0xb0] sm:$0xff]  ;;  %s1231_s16 = smov [#allocation2]   ;;  %s1093_s20 = sshll.u32 %s1713_s5, 4  ;;  %s1094_s20 = int_to_ptr.hbm [resolvable:$true] %s1093_s20 }
  0x11   :  { %218 = vmatpush.msrb.mxu2 %v53_v26  ;;  %171 = vmatpush.msrb.mxu0 %v46_v29  ;;  %v25_v34 = vld [vmem:[%s1708_s0 + $0x20] sm:$0xff]  ;;  %v52_v35 = vld [vmem:[%s1709_s1 + $0xb8] sm:$0xff]  ;;  %v50_v37 = vld [vmem:[%s1709_s1 + $0xa8] sm:$0xff]  ;;  %s1091_s17 = sshll.u32 %s1231_s16, 4  ;;  %s1233_s21 = smov 8   ;;  %s1092_s17 = int_to_ptr.vmem [resolvable:$true] %s1091_s17 }
  0x12   :  { %1111 = vmatmul.msk.f32.vlgmr.msrb.gmra.mxu2 %vm61_vm0, %v27_v30  ;;  %241 = vmatpush.msrb.mxu3 %v57_v31  ;;  %v49_v38 = vld [vmem:[%s1709_s1 + $0xa0] sm:$0xff]  ;;  %v26_v39 = vld [vmem:[%s1708_s0 + $0x28] sm:$0xff] }
  0x13   :  { %1112 = vmatmul.msk.f32.vlgmr.msrb.gmra.mxu3 %vm61_vm0, %v28_v32  ;;  %172 = vmatpush.msrb.mxu0 %v45_v33  ;;  %v254_v1 = vld [vmem:[%s1712_s4] sm:$0xff]  ;;  %s1230_s4 = smov 112  }
  0x14   :  { %1109 = vmatmul.msk.f32.vlgmr.msrb.gmra.mxu0 %vm61_vm0, %v25_v34  ;;  %192 = vmatpush.msrb.mxu1 %v52_v35 }
  0x16   :  { %193 = vmatpush.msrb.mxu1 %v51_v36 }
  0x18   :  { %194 = vmatpush.msrb.mxu1 %v50_v37 }
  0x1a   :  { %195 = vmatpush.msrb.mxu1 %v49_v38 }
  0x1b   :  { %1110 = vmatmul.msk.f32.vlgmr.msrb.gmra.mxu1 %vm61_vm0, %v26_v39 }
  0x86   :  { %v1392_v40 = vpop.f32.mrf.mxu0 }
  0x87   :  { %256 = vrot.lane.b32.xlu2 %v1392_v40, %s1229_s23  ;;  %v246_v50 = vmul.f32 0.35355338, %v1392_v40 }
  0x8d   :  { %v1395_v41 = vpop.f32.mrf.mxu2  ;;  %v1402_v44 = vpop.f32.mrf.mxu1 }
  0x8e   :  { %v1397_v42 = vpop.f32.mrf.mxu3  ;;  %313 = vrot.lane.b32.xlu0 %v1395_v41, %s1229_s23  ;;  %v247_v52 = vmul.f32 0.35355338, %v1402_v44  ;;  %v248_v54 = vmul.f32 0.35355338, %v1395_v41 }
  0x8f   :  { %v1150_v43 = vpack.i.bf16 %v1397_v42, %v1395_v41  ;;  %285 = vrot.lane.b32.xlu2 %v1402_v44, %s1229_s23  ;;  %v249_v57 = vmul.f32 0.35355338, %v1397_v42 }
  0x91   :  { %v1409_v46 = vpop.f32.mrf.mxu0 }
  0x92   :  { %v250_v61 = vmul.f32 0.35355338, %v1409_v46 }
  0x95   :  { %v1405_v45 = vpop.f32.mrf.mxu2 }
  0x96   :  { %341 = vrot.lane.b32.xlu0 %v1397_v42, %s1229_s23  ;;  %425 = vrot.lane.b32.xlu1 %v1405_v45, %s1229_s23  ;;  %v1411_v47 = vpop.f32.mrf.mxu3  ;;  %v252_v58 = vmul.f32 0.35355338, %v1405_v45 }
  0x97   :  { %v253_v62 = vmul.f32 0.35355338, %v1411_v47 }
  0x98   :  { %v1415_v48 = vpop.f32.mrf.mxu1 }
  0x99   :  { %v251_v0 = vmul.f32 0.35355338, %v1415_v48 }
  0x9e   :  { %453 = vrot.lane.b32.xlu1 %v1411_v47, %s1229_s23  ;;  %369 = vrot.lane.b32.xlu0 %v1409_v46, %s1229_s23 }
  0xa6   :  { %397 = vrot.lane.b32.xlu1 %v1415_v48, %s1229_s23 }
  0xe1   :  { %v257_v49 = vpop.permute.xlu2 %256 }
  0xe2   :  { %1113 = vmatpush.xpose.msk.msra.mxu0 %vm258_vm1, %v257_v49 }
  0xe5   :  { %1114 = vmatmul.msk.f32.vlgmr.msra.gmra.mxu0 %vm258_vm1, %v246_v50 }
  0xe9   :  { %v286_v51 = vpop.permute.xlu2 %285 }
  0xea   :  { %1115 = vmatpush.xpose.msk.msra.mxu1 %vm258_vm1, %v286_v51 }
  0xed   :  { %1116 = vmatmul.msk.f32.vlgmr.msra.gmra.mxu1 %vm258_vm1, %v247_v52 }
 0x100   :  { %v314_v53 = vpop.permute.xlu0 %313 }
 0x101   :  { %1117 = vmatpush.xpose.msk.msra.mxu2 %vm258_vm1, %v314_v53 }
 0x104   :  { %1118 = vmatmul.msk.f32.vlgmr.msra.gmra.mxu2 %vm258_vm1, %v248_v54 }
 0x108   :  { %v342_v55 = vpop.permute.xlu0 %341  ;;  %v426_v56 = vpop.permute.xlu1 %425 }
 0x109   :  { %1119 = vmatpush.xpose.msk.msra.mxu3 %vm258_vm1, %v342_v55  ;;  %1125 = vmatpush.xpose.msk.msrb.mxu2 %vm258_vm1, %v426_v56 }
 0x10c   :  { %1120 = vmatmul.msk.f32.vlgmr.msra.gmra.mxu3 %vm258_vm1, %v249_v57  ;;  %1126 = vmatmul.msk.f32.vlgmr.msrb.gmra.mxu2 %vm258_vm1, %v252_v58 }
 0x110   :  { %v454_v59 = vpop.permute.xlu1 %453  ;;  %v370_v60 = vpop.permute.xlu0 %369 }
 0x111   :  { %1121 = vmatpush.xpose.msk.msrb.mxu0 %vm258_vm1, %v370_v60  ;;  %1127 = vmatpush.xpose.msk.msrb.mxu3 %vm258_vm1, %v454_v59 }
 0x114   :  { %1122 = vmatmul.msk.f32.vlgmr.msrb.gmra.mxu0 %vm258_vm1, %v250_v61  ;;  %1128 = vmatmul.msk.f32.vlgmr.msrb.gmra.mxu3 %vm258_vm1, %v253_v62 }
 0x118   :  { %v398_v63 = vpop.permute.xlu1 %397 }
 0x119   :  { %1123 = vmatpush.xpose.msk.msrb.mxu1 %vm258_vm1, %v398_v63 }
 0x11c   :  { %1124 = vmatmul.msk.f32.vlgmr.msrb.gmra.mxu1 %vm258_vm1, %v251_v0 }
 0x162   :  { %v281_v2 = vpop.f32.mrf.mxu0 }
 0x163   :  { %v282_v3 = vadd.f32 %v281_v2, %v254_v1 }
 0x165   :  { %v480_v4 = vsel %vm258_vm1, %v282_v3, -inf }
 0x166   :  { %481 = vmax.xlane.f32.xlu2 %v480_v4 }
 0x16a   :  { %v309_v8 = vpop.f32.mrf.mxu1 }
 0x16b   :  { %v310_v9 = vadd.f32 %v309_v8, %v254_v1 }
 0x16d   :  { %v483_v17 = vsel %vm258_vm1, %v310_v9, -inf }
 0x187   :  { %v337_v5 = vpop.f32.mrf.mxu2 }
 0x188   :  { %v1446_v6 = vadd.f32 %v337_v5, %v254_v1 }
 0x18a   :  { %v486_v7 = vsel %vm258_vm1, %v1446_v6, -inf }
 0x18b   :  { %487 = vmax.xlane.f32.xlu2 %v486_v7 }
 0x18f   :  { %v365_v10 = vpop.f32.mrf.mxu3  ;;  %v449_v11 = vpop.f32.mrf.mxu2 }
 0x190   :  { %v366_v12 = vadd.f32 %v365_v10, %v254_v1  ;;  %v450_v13 = vadd.f32 %v449_v11, %v254_v1  ;;  %v1155_v11 = vpack.i.bf16 %v1392_v40, %v1405_v45 }
 0x191   :  { %v393_v16 = vpop.f32.mrf.mxu0 }
 0x192   :  { %v498_v14 = vsel %vm258_vm1, %v450_v13, -inf  ;;  %v489_v15 = vsel %vm258_vm1, %v366_v12, -inf  ;;  %v394_v18 = vadd.f32 %v393_v16, %v254_v1 }
 0x193   :  { %499 = vmax.xlane.f32.xlu1 %v498_v14  ;;  %490 = vmax.xlane.f32.xlu0 %v489_v15 }
 0x194   :  { %484 = vmax.xlane.f32.xlu2 %v483_v17  ;;  %v492_v24 = vsel %vm258_vm1, %v394_v18, -inf }
 0x197   :  { %v477_v19 = vpop.f32.mrf.mxu3 }
 0x198   :  { %v478_v20 = vadd.f32 %v477_v19, %v254_v1 }
 0x199   :  { %v421_v21 = vpop.f32.mrf.mxu1 }
 0x19a   :  { %v422_v22 = vadd.f32 %v421_v21, %v254_v1  ;;  %v501_v23 = vsel %vm258_vm1, %v478_v20, -inf }
 0x19b   :  { %502 = vmax.xlane.f32.xlu0 %v501_v23  ;;  %493 = vmax.xlane.f32.xlu1 %v492_v24 }
 0x19c   :  { %v495_v25 = vsel %vm258_vm1, %v422_v22, -inf }
 0x19d   :  { %496 = vmax.xlane.f32.xlu2 %v495_v25 }
 0x1d9   :  { %v482_v26 = vpop.xlane.xlu2 %481 }
 0x1da   :  { %v504_v27 = vsub.f32 %v282_v3, %v482_v26 }
 0x1dc   :  { %v512_v28 = vmul.f32 1.442695, %v504_v27 }
 0x1de   :  { %1171 = vpow2.f32 %v512_v28 }
 0x1e4   :  { %v1456_v29 = vpop.eup %1171 }
 0x1e5   :  { %v528_v30 = vsel %vm258_vm1, %v1456_v29, 0.0 }
 0x1e6   :  { %529 = vadd.xlane.f32.xlu0 %v528_v30 }
 0x1fe   :  { %v488_v31 = vpop.xlane.xlu2 %487 }
 0x1ff   :  { %v506_v57 = vsub.f32 %v1446_v6, %v488_v31 }
 0x201   :  { %v516_v63 = vmul.f32 1.442695, %v506_v57 }
 0x206   :  { %v500_v32 = vpop.xlane.xlu1 %499  ;;  %v491_v33 = vpop.xlane.xlu0 %490 }
 0x207   :  { %v510_v34 = vsub.f32 %v450_v13, %v500_v32  ;;  %v485_v35 = vpop.xlane.xlu2 %484  ;;  %v507_v60 = vsub.f32 %v366_v12, %v491_v33  ;;  %v1160_v12 = vpack.i.bf16 %v1411_v47, %v1402_v44  ;;  %v1165_v13 = vpack.i.bf16 %v1415_v48, %v1409_v46 }
 0x208   :  { %v505_v36 = vsub.f32 %v310_v9, %v485_v35 }
 0x209   :  { %v524_v37 = vmul.f32 1.442695, %v510_v34  ;;  %v518_v0 = vmul.f32 1.442695, %v507_v60 }
 0x20a   :  { %v514_v38 = vmul.f32 1.442695, %v505_v36 }
 0x20b   :  { %1173 = vpow2.f32 %v524_v37 }
 0x20c   :  { %1175 = vpow2.f32 %v514_v38 }
 0x20e   :  { %v503_v39 = vpop.xlane.xlu0 %502  ;;  %v494_v49 = vpop.xlane.xlu1 %493 }
 0x20f   :  { %v511_v50 = vsub.f32 %v478_v20, %v503_v39  ;;  %v508_v51 = vsub.f32 %v394_v18, %v494_v49 }
 0x210   :  { %v497_v52 = vpop.xlane.xlu2 %496 }
 0x211   :  { %v1460_v53 = vpop.eup %1173  ;;  %v526_v54 = vmul.f32 1.442695, %v511_v50  ;;  %v520_v55 = vmul.f32 1.442695, %v508_v51  ;;  %v509_v56 = vsub.f32 %v422_v22, %v497_v52 }
 0x212   :  { %v546_v58 = vsel %vm258_vm1, %v1460_v53, 0.0  ;;  %v1465_v59 = vpop.eup %1175 }
 0x213   :  { %1177 = vpow2.f32 %v526_v54  ;;  %v522_v61 = vmul.f32 1.442695, %v509_v56  ;;  %547 = vadd.xlane.f32.xlu2 %v546_v58  ;;  %v531_v62 = vsel %vm258_vm1, %v1465_v59, 0.0 }
 0x214   :  { %1179 = vpow2.f32 %v520_v55  ;;  %532 = vadd.xlane.f32.xlu1 %v531_v62 }
 0x215   :  { %1181 = vpow2.f32 %v522_v61 }
 0x216   :  { %1183 = vpow2.f32 %v516_v63 }
 0x217   :  { %1185 = vpow2.f32 %v518_v0 }
 0x219   :  { %v1469_v1 = vpop.eup %1177 }
 0x21a   :  { %v1471_v2 = vpop.eup %1179  ;;  %v549_v3 = vsel %vm258_vm1, %v1469_v1, 0.0 }
 0x21b   :  { %v1475_v4 = vpop.eup %1181  ;;  %550 = vadd.xlane.f32.xlu2 %v549_v3  ;;  %v540_v5 = vsel %vm258_vm1, %v1471_v2, 0.0 }
 0x21c   :  { %541 = vadd.xlane.f32.xlu0 %v540_v5  ;;  %v543_v6 = vsel %vm258_vm1, %v1475_v4, 0.0  ;;  %v1481_v7 = vpop.eup %1183 }
 0x21d   :  { %544 = vadd.xlane.f32.xlu1 %v543_v6  ;;  %v1483_v8 = vpop.eup %1185  ;;  %v534_v9 = vsel %vm258_vm1, %v1481_v7, 0.0 }
 0x21e   :  { %v537_v10 = vsel %vm258_vm1, %v1483_v8, 0.0 }
 0x224   :  { %535 = vadd.xlane.f32.xlu0 %v534_v9 }
 0x225   :  { %538 = vadd.xlane.f32.xlu1 %v537_v10 }
 0x233   :  { %1151 = vrot.lane.b32.xlu2 %v1150_v43, %s1230_s4 }
 0x238   :  { %1156 = vrot.lane.b32.xlu0 %v1155_v11, %s1230_s4 }
 0x23e   :  { %1161 = vrot.lane.b32.xlu1 %v1160_v12, %s1230_s4 }
 0x240   :  { %1166 = vrot.lane.b32.xlu0 %v1165_v13, %s1230_s4 }
 0x259   :  { %v530_v14 = vpop.xlane.xlu0 %529 }
 0x25a   :  { %1187 = vrcp.f32 %v530_v14  ;;  %v563_v48 = vand.u32 2147483648, %v530_v14  ;;  %vm557_vm3 = vweird.f32 %v530_v14  ;;  %v561_v18 = vand.u32 2147483647, %v530_v14 }
 0x25c   :  { %v564_v30 = vor.u32 1.1754944e-38, %v563_v48  ;;  %vm562_vm5 = vcmp.eq.f32.partialorder %v561_v18, 8.507059e+37 }
 0x260   :  { %v1188_v15 = vpop.eup %1187 }
 0x261   :  { %v553_v17 = vmul.f32 %v1188_v15, %v530_v14  ;;  %vm558_vm2 = vweird.f32 %v1188_v15 }
 0x262   :  { %vm1516_vm4 = vmor %vm557_vm3, %vm558_vm2 }
 0x263   :  { %v554_v42 = vsub.f32 1.0, %v553_v17 }
 0x265   :  { %v555_v44 = vmul.f32 %v1188_v15, %v554_v42 }
 0x267   :  { %v556_v47 = vadd.f32 %v1188_v15, %v555_v44 }
 0x269   :  { %v560_v25 = vsel %vm1516_vm4, %v1188_v15, %v556_v47 }
 0x26a   :  { %v565_v33 = vsel %vm562_vm5, %v564_v30, %v560_v25 }
 0x26b   :  { %v1545_v49 = vmul.f32 %v1456_v29, %v565_v33 }
 0x286   :  { %v1498_v16 = vpop.xlane.xlu2 %547 }
 0x287   :  { %v1500_v41 = vpop.xlane.xlu1 %532  ;;  %1189 = vrcp.f32 %v1498_v16  ;;  %v653_v34 = vand.u32 2147483648, %v1498_v16  ;;  %vm647_vm6 = vweird.f32 %v1498_v16  ;;  %v651_v50 = vand.u32 2147483647, %v1498_v16 }
 0x288   :  { %1191 = vrcp.f32 %v1500_v41  ;;  %v576_v56 = vand.u32 2147483647, %v1500_v41  ;;  %v578_v57 = vand.u32 2147483648, %v1500_v41  ;;  %vm572_vm8 = vweird.f32 %v1500_v41 }
 0x289   :  { %v1548_v51 = vor.u32 1.1754944e-38, %v653_v34  ;;  %vm1566_vm12 = vcmp.eq.f32.partialorder %v651_v50, 8.507059e+37 }
 0x28d   :  { %v1510_v46 = vpop.eup %1189 }
 0x28e   :  { %v1503_v40 = vpop.xlane.xlu2 %550  ;;  %v643_v19 = vmul.f32 %v1510_v46, %v1498_v16  ;;  %v1522_v24 = vpop.eup %1191  ;;  %vm648_vm7 = vweird.f32 %v1510_v46 }
 0x28f   :  { %v1505_v43 = vpop.xlane.xlu0 %541  ;;  %1193 = vrcp.f32 %v1503_v40  ;;  %v568_v35 = vmul.f32 %v1522_v24, %v1500_v41  ;;  %v666_v29 = vand.u32 2147483647, %v1503_v40  ;;  %v668_v61 = vand.u32 2147483648, %v1503_v40  ;;  %vm1578_vm13 = vmor %vm647_vm6, %vm648_vm7 }
 0x290   :  { %v1507_v45 = vpop.xlane.xlu1 %544  ;;  %1195 = vrcp.f32 %v1505_v43  ;;  %v644_v32 = vsub.f32 1.0, %v643_v19  ;;  %vm573_vm9 = vweird.f32 %v1522_v24  ;;  %vm662_vm10 = vweird.f32 %v1503_v40 }
 0x291   :  { %v569_v52 = vsub.f32 1.0, %v568_v35  ;;  %v621_v13 = vand.u32 2147483647, %v1505_v43  ;;  %v623_v35 = vand.u32 2147483648, %v1505_v43  ;;  %v669_v41 = vor.u32 1.1754944e-38, %v668_v61 }
 0x292   :  { %v645_v39 = vmul.f32 %v1510_v46, %v644_v32 }
 0x293   :  { %v570_v6 = vmul.f32 %v1522_v24, %v569_v52 }
 0x294   :  { %v646_v0 = vadd.f32 %v1510_v46, %v645_v39 }
 0x295   :  { %v1529_v28 = vpop.eup %1193 }
 0x296   :  { %v1152_v20 = vpop.permute.xlu2 %1151  ;;  %v1531_v31 = vpop.eup %1195  ;;  %v658_v36 = vmul.f32 %v1529_v28, %v1503_v40  ;;  %v650_v16 = vsel %vm1578_vm13, %v1510_v46, %v646_v0  ;;  %vm663_vm5 = vweird.f32 %v1529_v28  ;;  %vm1600_vm13 = vmor %vm572_vm8, %vm573_vm9  ;;  %vm617_vm8 = vweird.f32 %v1505_v43 }
 0x297   :  { %v1154_v22 = vunpack.i.h.bf16 %v1152_v20  ;;  %v1520_v23 = vpop.xlane.xlu0 %535  ;;  %v1153_v26 = vunpack.i.l.bf16 %v1152_v20  ;;  %v613_v37 = vmul.f32 %v1531_v31, %v1505_v43  ;;  %v571_v20 = vadd.f32 %v1522_v24, %v570_v6 }
 0x298   :  { %1197 = vrcp.f32 %v1520_v23  ;;  %v1527_v27 = vpop.xlane.xlu1 %538  ;;  %v659_v58 = vsub.f32 1.0, %v658_v36  ;;  %v593_v3 = vand.u32 2147483648, %v1520_v23  ;;  %v591_v10 = vand.u32 2147483647, %v1520_v23 }
 0x299   :  { %771 = vmatpush.msra.mxu3 %v1154_v22  ;;  %1199 = vrcp.f32 %v1507_v45  ;;  %745 = vmatpush.msra.mxu2 %v1153_v26  ;;  %v614_v62 = vsub.f32 1.0, %v613_v37  ;;  %vm587_vm14 = vweird.f32 %v1520_v23  ;;  %v608_v47 = vand.u32 2147483648, %v1527_v27 }
 0x29a   :  { %1201 = vrcp.f32 %v1527_v27  ;;  %v660_v12 = vmul.f32 %v1529_v28, %v659_v58  ;;  %v594_v48 = vor.u32 1.1754944e-38, %v593_v3  ;;  %v606_v19 = vand.u32 2147483647, %v1527_v27 }
 0x29b   :  { %v615_v42 = vmul.f32 %v1531_v31, %v614_v62  ;;  %vm592_vm3 = vcmp.eq.f32.partialorder %v591_v10, 8.507059e+37  ;;  %vm602_vm4 = vweird.f32 %v1527_v27  ;;  %vm618_vm6 = vweird.f32 %v1531_v31 }
 0x29c   :  { %v661_v32 = vadd.f32 %v1529_v28, %v660_v12  ;;  %vm1627_vm9 = vmor %vm617_vm8, %vm618_vm6  ;;  %v636_v40 = vand.u32 2147483647, %v1507_v45  ;;  %v884_v12 = vld [vmem:[%s1710_s2 + $0x20] sm:$0xff] }
 0x29d   :  { %v616_v46 = vadd.f32 %v1531_v31, %v615_v42 }
 0x29e   :  { %v1198_v38 = vpop.eup %1197 }
 0x29f   :  { %v583_v54 = vmul.f32 %v1198_v38, %v1520_v23  ;;  %v1551_v55 = vpop.eup %1199  ;;  %vm588_vm11 = vweird.f32 %v1198_v38  ;;  %v609_v23 = vor.u32 1.1754944e-38, %v608_v47  ;;  %v620_v43 = vsel %vm1627_vm9, %v1531_v31, %v616_v46 }
 0x2a0   :  { %v1202_v60 = vpop.eup %1201  ;;  %v628_v14 = vmul.f32 %v1551_v55, %v1507_v45  ;;  %vm589_vm15 = vmor %vm587_vm14, %vm588_vm11  ;;  %vm607_vm11 = vcmp.eq.f32.partialorder %v606_v19, 8.507059e+37 }
 0x2a1   :  { %v584_v63 = vsub.f32 1.0, %v583_v54  ;;  %v598_v5 = vmul.f32 %v1202_v60, %v1527_v27  ;;  %vm603_vm2 = vweird.f32 %v1202_v60  ;;  %vm1613_vm14 = vmor %vm662_vm10, %vm663_vm5  ;;  %v655_v54 = vsel %vm1566_vm12, %v1548_v51, %v650_v16 }
 0x2a2   :  { %v629_v22 = vsub.f32 1.0, %v628_v14  ;;  %vm604_vm7 = vmor %vm602_vm4, %vm603_vm2  ;;  %vm577_vm10 = vcmp.eq.f32.partialorder %v576_v56, 8.507059e+37  ;;  %vm667_vm12 = vcmp.eq.f32.partialorder %v666_v29, 8.507059e+37  ;;  %v624_v56 = vor.u32 1.1754944e-38, %v623_v35  ;;  %v887_v14 = vld [vmem:[%s1710_s2 + $0x38] sm:$0xff] }
 0x2a3   :  { %v585_v9 = vmul.f32 %v1198_v38, %v584_v63  ;;  %v599_v15 = vsub.f32 1.0, %v598_v5  ;;  %vm633_vm2 = vweird.f32 %v1551_v55  ;;  %v656_v31 = vmul.f32 %v1460_v53, %v655_v54 }
 0x2a4   :  { %v630_v50 = vmul.f32 %v1551_v55, %v629_v22  ;;  %vm637_vm5 = vcmp.eq.f32.partialorder %v636_v40, 8.507059e+37 }
 0x2a5   :  { %v586_v44 = vadd.f32 %v1198_v38, %v585_v9  ;;  %v600_v18 = vmul.f32 %v1202_v60, %v599_v15  ;;  %v885_v15 = vld [vmem:[%s1710_s2 + $0x28] sm:$0xff] }
 0x2a7   :  { %v590_v21 = vsel %vm589_vm15, %v1198_v38, %v586_v44  ;;  %v601_v26 = vadd.f32 %v1202_v60, %v600_v18  ;;  %v575_v38 = vsel %vm1600_vm13, %v1522_v24, %v571_v20  ;;  %v579_v24 = vor.u32 1.1754944e-38, %v578_v57 }
 0x2a8   :  { %v595_v25 = vsel %vm592_vm3, %v594_v48, %v590_v21  ;;  %vm622_vm15 = vcmp.eq.f32.partialorder %v621_v13, 8.507059e+37  ;;  %v638_v57 = vand.u32 2147483648, %v1507_v45  ;;  %vm632_vm3 = vweird.f32 %v1507_v45  ;;  %v886_v13 = vld [vmem:[%s1710_s2 + $0x30] sm:$0xff] }
 0x2a9   :  { %v596_v30 = vmul.f32 %v1481_v7, %v595_v25  ;;  %v605_v33 = vsel %vm604_vm7, %v1202_v60, %v601_v26  ;;  %v580_v51 = vsel %vm577_vm10, %v579_v24, %v575_v38  ;;  %v625_v62 = vsel %vm622_vm15, %v624_v56, %v620_v43  ;;  %vm1653_vm4 = vmor %vm632_vm3, %vm633_vm2 }
 0x2aa   :  { %v1157_v34 = vpop.permute.xlu0 %1156  ;;  %v610_v36 = vsel %vm607_vm11, %v609_v23, %v605_v33  ;;  %v581_v61 = vmul.f32 %v1465_v59, %v580_v51  ;;  %v626_v59 = vmul.f32 %v1471_v2, %v625_v62  ;;  %v639_v9 = vor.u32 1.1754944e-38, %v638_v57  ;;  %v883_v2 = vld [vmem:[%s1710_s2 + $0x18] sm:$0xff]  ;;  %v1170_v23 = vld [vmem:[%s1711_s3] ss:$0 sm:$0xff]  ;;  %s1232_s3 = smov 128  }
 0x2ab   :  { %v1159_v37 = vunpack.i.h.bf16 %v1157_v34  ;;  %v1158_v7 = vunpack.i.l.bf16 %v1157_v34  ;;  %1131 = vmatmul.msk.f32.vlgmr.msra.gmra.mxu2 %vm258_vm1, %v596_v30  ;;  %v611_v52 = vmul.f32 %v1483_v8, %v610_v36  ;;  %v665_v8 = vsel %vm1613_vm14, %v1529_v28, %v661_v32 }
 0x2ac   :  { %v631_v28 = vadd.f32 %v1551_v55, %v630_v50  ;;  %v670_v29 = vsel %vm667_vm12, %v669_v41, %v665_v8 }
 0x2ad   :  { %693 = vmatpush.msra.mxu0 %v1159_v37  ;;  %849 = vmatpush.msrb.mxu2 %v1158_v7  ;;  %v671_v45 = vmul.f32 %v1469_v1, %v670_v29  ;;  %v882_v1 = vld [vmem:[%s1710_s2 + $0x10] sm:$0xff] }
 0x2ae   :  { %1132 = vmatmul.msk.f32.vlgmr.msra.gmra.mxu3 %vm258_vm1, %v611_v52  ;;  %1129 = vmatmul.msk.f32.vlgmr.msra.gmra.mxu0 %vm258_vm1, %v1545_v49  ;;  %v635_v53 = vsel %vm1653_vm4, %v1551_v55, %v631_v28  ;;  %v880_v55 = vld [vmem:[%s1710_s2] sm:$0xff] }
 0x2af   :  { %v640_v10 = vsel %vm637_vm5, %v639_v9, %v635_v53  ;;  %952 = vmatpush.msra.mxu2 %v882_v1 }
 0x2b0   :  { %v1162_v60 = vpop.permute.xlu1 %1161  ;;  %v641_v11 = vmul.f32 %v1475_v4, %v640_v10  ;;  %v881_v4 = vld [vmem:[%s1710_s2 + $0x8] sm:$0xff] }
 0x2b1   :  { %v1164_v63 = vunpack.i.h.bf16 %v1162_v60  ;;  %v1163_v0 = vunpack.i.l.bf16 %v1162_v60 }
 0x2b2   :  { %v1167_v49 = vpop.permute.xlu0 %1166 }
 0x2b3   :  { %v1169_v5 = vunpack.i.h.bf16 %v1167_v49  ;;  %v1168_v6 = vunpack.i.l.bf16 %v1167_v49  ;;  %1135 = vmatmul.msk.f32.vlgmr.msrb.gmra.mxu2 %vm258_vm1, %v656_v31  ;;  %719 = vmatpush.msra.mxu1 %v1163_v0 }
 0x2b4   :  { %875 = vmatpush.msrb.mxu3 %v1164_v63  ;;  %1130 = vmatmul.msk.f32.vlgmr.msra.gmra.mxu1 %vm258_vm1, %v581_v61 }
 0x2b5   :  { %797 = vmatpush.msrb.mxu0 %v1168_v6  ;;  %823 = vmatpush.msrb.mxu1 %v1169_v5 }
 0x2b6   :  { %1136 = vmatmul.msk.f32.vlgmr.msrb.gmra.mxu3 %vm258_vm1, %v671_v45  ;;  %1133 = vmatmul.msk.f32.vlgmr.msrb.gmra.mxu0 %vm258_vm1, %v626_v59 }
 0x2b7   :  { %906 = vmatpush.msra.mxu0 %v880_v55  ;;  %975 = vmatpush.msra.mxu3 %v883_v2 }
 0x2b8   :  { %929 = vmatpush.msra.mxu1 %v881_v4  ;;  %1044 = vmatpush.msrb.mxu2 %v886_v13 }
 0x2b9   :  { %998 = vmatpush.msrb.mxu0 %v884_v12  ;;  %1067 = vmatpush.msrb.mxu3 %v887_v14 }
 0x2bc   :  { %1134 = vmatmul.msk.f32.vlgmr.msrb.gmra.mxu1 %vm258_vm1, %v641_v11 }
 0x2bd   :  { %1021 = vmatpush.msrb.mxu1 %v885_v15 }
 0x32b   :  { %v695_v17 = vpop.f32.mrf.mxu0 }
 0x32c   :  { %1137 = vmatmul.msk.f32.vlgmr.msra.gmra.mxu0 %vm258_vm1, %v695_v17 }
 0x32e   :  { %v747_v42 = vpop.f32.mrf.mxu2 }
 0x32f   :  { %1139 = vmatmul.msk.f32.vlgmr.msra.gmra.mxu2 %vm258_vm1, %v747_v42 }
 0x331   :  { %v773_v44 = vpop.f32.mrf.mxu3  ;;  %v721_v47 = vpop.f32.mrf.mxu1 }
 0x332   :  { %1140 = vmatmul.msk.f32.vlgmr.msra.gmra.mxu3 %vm258_vm1, %v773_v44  ;;  %1138 = vmatmul.msk.f32.vlgmr.msra.gmra.mxu1 %vm258_vm1, %v721_v47 }
 0x333   :  { %v799_v48 = vpop.f32.mrf.mxu0 }
 0x334   :  { %1141 = vmatmul.msk.f32.vlgmr.msrb.gmra.mxu0 %vm258_vm1, %v799_v48 }
 0x336   :  { %v851_v18 = vpop.f32.mrf.mxu2 }
 0x337   :  { %1143 = vmatmul.msk.f32.vlgmr.msrb.gmra.mxu2 %vm258_vm1, %v851_v18 }
 0x339   :  { %v877_v19 = vpop.f32.mrf.mxu3  ;;  %v825_v16 = vpop.f32.mrf.mxu1 }
 0x33a   :  { %1144 = vmatmul.msk.f32.vlgmr.msrb.gmra.mxu3 %vm258_vm1, %v877_v19  ;;  %1142 = vmatmul.msk.f32.vlgmr.msrb.gmra.mxu1 %vm258_vm1, %v825_v16 }
 0x3a9   :  { %v908_v20 = vpop.f32.mrf.mxu0 }
 0x3af   :  { %v931_v21 = vpop.f32.mrf.mxu1 }
 0x3b0   :  { %v1073_v22 = vadd.f32 %v931_v21, %v908_v20 }
 0x3b1   :  { %v1000_v46 = vpop.f32.mrf.mxu0 }
 0x3b2   :  { %v954_v25 = vpop.f32.mrf.mxu2 }
 0x3b3   :  { %v1074_v26 = vadd.f32 %v1073_v22, %v954_v25 }
 0x3b5   :  { %v977_v30 = vpop.f32.mrf.mxu3 }
 0x3b6   :  { %v1075_v32 = vadd.f32 %v1074_v26, %v977_v30 }
 0x3b7   :  { %v1023_v33 = vpop.f32.mrf.mxu1 }
 0x3b8   :  { %v1079_v34 = vadd.f32 %v1170_v23, %v1075_v32  ;;  %v1081_v27 = vadd.f32 %v1023_v33, %v1000_v46 }
 0x3ba   :  { %1080 = vst.msk [vmem:[#allocation2] sm:$0xff] %vm61_vm0, %v1079_v34  ;;  %v1046_v35 = vpop.f32.mrf.mxu2 }
 0x3bb   :  { %v1082_v36 = vadd.f32 %v1081_v27, %v1046_v35 }
 0x3bd   :  { %v1069_v37 = vpop.f32.mrf.mxu3 }
 0x3be   :  { %v1083_v7 = vadd.f32 %v1082_v36, %v1069_v37 }
 0x3c0   :  { %v1084_v38 = vadd.f32 %v1170_v23, %v1083_v7 }
 0x3c2   :  { %1086 = vst.msk [vmem:[#allocation2 + $0x8] sm:$0xff] %vm61_vm0, %v1084_v38 }
 0x3c3   :  { %1099 = dma.vmem_to_hbm [thread:$0]  %s1092_s17, 256, %s1094_s20, [#allocation3], %s1232_s3, %s1232_s3, %s1233_s21  }
 0x3c4   :  { %1227 = dma.done.wait [#allocation3], 256  }
 0x3c5   :  { %1228 = vsyncadd [#allocation3], 4294967040 }
 0x3c6   :  { %1104 = vsyncpa [#allocation3], 1 }

</bundles_post_ra>
